<compile_context>
chip_gen: v7x
topology: tpu7x:2x2x1
jax: 0.10.0
libtpu: 0.0.40
codegen_flags: <defaults>
</compile_context>

<pallas_src>
import functools
import math

import jax
import jax.numpy as jnp
from jax.experimental import pallas as pl
from jax.experimental.pallas import tpu as pltpu

EPS = 1e-5
VMEM_LIMIT = 32 * 1024 * 1024   # explicit; safe on v5e/v6e/v7x, >> our ~7 MiB peak


def _round_up(x, m):
    return (x + m - 1) // m * m


# ----------------------------------------------------------------------------
# Pallas kernels
# ----------------------------------------------------------------------------
def _matmul_kernel(a_ref, b_ref, bias_ref, o_ref, *, relu):
    """One output-column tile: full-K bf16 dot on the MXU, f32 accumulate,
    fused (folded-BN) bias and optional ReLU."""
    r = jnp.dot(a_ref[...], b_ref[...], preferred_element_type=jnp.float32)
    r = r + bias_ref[...]
    if relu:
        r = jnp.maximum(r, 0.0)
    o_ref[...] = r.astype(o_ref.dtype)


def pallas_matmul(A, Bm, bias=None, relu=False):
    """(M,K) @ (K,N) (+bias(N,)) (+ReLU).  A resident in VMEM (full K, one block);
    weight streamed in 256/512-wide N tiles; bf16 MXU inputs, f32 accumulation."""
    M, K = A.shape
    K2, N = Bm.shape
    assert K == K2
    TM = _round_up(max(M, 16), 16)          # all rows in one block (M <= 32 here)
    Kp = _round_up(K, 128)                  # single K block -> A fetched once
    Np = _round_up(N, 256)
    TN = 512 if (Np % 512 == 0 and Np >= 1024) else 256

    Ap = jnp.pad(A, ((0, TM - M), (0, Kp - K))).astype(jnp.bfloat16)
    Bp = jnp.pad(Bm, ((0, Kp - K), (0, Np - N))).astype(jnp.bfloat16)
    if bias is None:
        bias = jnp.zeros((N,), jnp.float32)
    bp = jnp.pad(bias.astype(jnp.float32), (0, Np - N)).reshape(1, Np)

    cost = pl.CostEstimate(
        flops=2 * TM * Kp * Np,
        transcendentals=0,
        bytes_accessed=TM * Kp * 2 + Kp * Np * 2 + TM * Np * 4 + Np * 4)

    out = pl.pallas_call(
        functools.partial(_matmul_kernel, relu=relu),
        out_shape=jax.ShapeDtypeStruct((TM, Np), jnp.float32),
        grid_spec=pltpu.PrefetchScalarGridSpec(
            num_scalar_prefetch=0,
            grid=(Np // TN,),
            in_specs=[
                pl.BlockSpec((TM, Kp), lambda j: (0, 0)),   # A: resident, full K
                pl.BlockSpec((Kp, TN), lambda j: (0, j)),   # weight tiles stream
                pl.BlockSpec((1, TN), lambda j: (0, j)),
            ],
            out_specs=pl.BlockSpec((TM, TN), lambda j: (0, j)),
        ),
        compiler_params=pltpu.CompilerParams(
            dimension_semantics=("parallel",),
            vmem_limit_bytes=VMEM_LIMIT),
        cost_estimate=cost,
    )(Ap, Bp, bp)
    return out[:M, :N]


def _conv3_batch_kernel(a_ref, w_ref, b_ref, o_ref):
    """One scale-chunk 3x3 conv as an im2col matmul: (Mp, 3*csP) @ (3*csP, csP),
    fused folded-BN bias + ReLU."""
    r = jnp.dot(a_ref[...], w_ref[...], preferred_element_type=jnp.float32)
    o_ref[...] = jnp.maximum(r + b_ref[...], 0.0)


def batched_conv3(x, w_all, b_all, cs, csP):
    """All (scales-1) independent conv3x3(+BN+ReLU) branches of a bottleneck block
    in ONE pallas_call with a leading ('parallel') grid axis over the scale index.
    x: (B, L, bott) f32; w_all: (S-1, 3*csP, csP) bf16; b_all: (S-1, 1, csP) f32."""
    B, L, _ = x.shape
    S1 = w_all.shape[0]
    M = B * L
    Mp = _round_up(M, 16)

    # channel-last im2col: pad L by 1 (per batch), 3 shifted taps concat on lanes.
    xc = x[:, :, cs:].reshape(B, L, S1, cs)                       # chunks s=1..S-1
    xc = jnp.pad(xc, ((0, 0), (1, 1), (0, 0), (0, csP - cs)))     # (B, L+2, S1, csP)
    A = jnp.concatenate([xc[:, k:k + L] for k in range(3)], axis=-1)  # col = k*csP+ci
    A = jnp.transpose(A, (2, 0, 1, 3)).reshape(S1, M, 3 * csP)
    A = jnp.pad(A, ((0, 0), (0, Mp - M), (0, 0))).astype(jnp.bfloat16)

    cost = pl.CostEstimate(
        flops=2 * S1 * Mp * 3 * csP * csP,
        transcendentals=0,
        bytes_accessed=S1 * (Mp * 3 * csP * 2 + 3 * csP * csP * 2 + Mp * csP * 4))

    out = pl.pallas_call(
        _conv3_batch_kernel,
        out_shape=jax.ShapeDtypeStruct((S1, Mp, csP), jnp.float32),
        grid_spec=pltpu.PrefetchScalarGridSpec(
            num_scalar_prefetch=0,
            grid=(S1,),
            in_specs=[
                pl.BlockSpec((None, Mp, 3 * csP), lambda s: (s, 0, 0)),
                pl.BlockSpec((None, 3 * csP, csP), lambda s: (s, 0, 0)),
                pl.BlockSpec((None, 1, csP), lambda s: (s, 0, 0)),
            ],
            out_specs=pl.BlockSpec((None, Mp, csP), lambda s: (s, 0, 0)),
        ),
        compiler_params=pltpu.CompilerParams(
            dimension_semantics=("parallel",),
            vmem_limit_bytes=VMEM_LIMIT),
        cost_estimate=cost,
    )(A, w_all, b_all)
    return [out[s, :M, :cs].reshape(B, L, cs) for s in range(S1)]


def _shrink_kernel(x_ref, st_ref, o_ref):
    """Fused Shrinkage_ECA hot path (lane-dense: C on lanes).
    st = sigmoid(eca_conv(gap|x|)) * threshold, broadcast over L."""
    x = x_ref[...]
    ax = jnp.abs(x)
    sub = ax - ax * st_ref[...]                          # |x| - (|x|*sig)*thr
    sgn = jnp.where(x > 0, 1.0, jnp.where(x < 0, -1.0, 0.0))
    o_ref[...] = sgn * jnp.maximum(sub, 0.0)


def pallas_shrink(x, scale_thr):
    """x: (B, L, C) f32, scale_thr: (B, C) f32 (C is a multiple of 128)."""
    B, L, C = x.shape
    return pl.pallas_call(
        _shrink_kernel,
        out_shape=jax.ShapeDtypeStruct((B, L, C), x.dtype),
    )(x, scale_thr[:, None, :])


# ----------------------------------------------------------------------------
# JAX glue (channels-last layout; tiny ops left to XLA to fuse)
# ----------------------------------------------------------------------------
def conv1x1(x, w_kn, bias=None, relu=False, stride=1):
    """nn.Conv1d(k=1, bias=False) [+ folded BN bias + ReLU] on (B, L, C) activations."""
    if stride > 1:
        x = x[:, ::stride, :]
    B, L, Cin = x.shape
    y = pallas_matmul(x.reshape(B * L, Cin), w_kn, bias=bias, relu=relu)
    return y.reshape(B, L, w_kn.shape[1])


def channel_conv1d(v, w):
    """Conv1d(1, 1, k, padding=(k-1)//2, bias=False) along the channel axis. v:(B,C)."""
    k = w.shape[0]
    pad = (k - 1) // 2
    C = v.shape[1]
    vp = jnp.pad(v, ((0, 0), (pad, pad)))
    out = jnp.zeros_like(v)
    for j in range(k):
        out = out + w[j] * vp[:, j:j + C]
    return out


def eca_ksize(c, b=1, gamma=2):
    t = int(abs((math.log(c, 2) + b) / gamma))
    return t if t % 2 else t + 1


def eca_add(y, w):
    """EfficientChannelAttention.forward: sigmoid(conv(avgpool(y))) + y (additive,
    exactly as in the PyTorch source).  y: (B, L, c)."""
    v = jnp.mean(y, axis=1)                               # gap over L -> (B, c)
    sig = jax.nn.sigmoid(channel_conv1d(v, w))            # (B, c)
    return sig[:, None, :] + y


def shrinkage_eca(x, p):
    """Shrinkage_ECA.forward (ECA-gated soft thresholding).  x: (B, L, C)."""
    ax = jnp.abs(x)
    v = jnp.mean(ax, axis=1)                              # gap(|x|) -> (B, C), shared
    eca_scale = jax.nn.sigmoid(channel_conv1d(v, p['shr_eca_w']))
    h = pallas_matmul(v, p['shr_fc1_w'], p['shr_fc1_b'], relu=True)
    g = jax.nn.sigmoid(pallas_matmul(h, p['shr_fc2_w'], p['shr_fc2_b']))
    thr = v * g                                           # average * fc(average)
    return pallas_shrink(x, eca_scale * thr)


# ----------------------------------------------------------------------------
# GatedRes2NetBottleneck / GatedFCN forward
# ----------------------------------------------------------------------------
def block_forward(x, p, cfg):
    stride, scales, cs, csP = cfg['stride'], cfg['scales'], cfg['cs'], cfg['csP']
    identity = x
    out = conv1x1(x, p['conv1_w'], p['conv1_b'], relu=True, stride=stride)  # (B,L',bott)

    ys = [out[:, :, :cs]]
    conv_ys = batched_conv3(out, p['conv2_w'], p['conv2_b'], cs, csP)       # 5 branches
    before = []
    for s in range(1, scales):
        y = conv_ys[s - 1]
        if s == 1:
            ys.append(eca_add(y, p['se_w'][0]))
        else:
            att = before[-1] + ys[-1]                     # pre-SE[s-1] + post-SE[s-1]
            ys.append(eca_add(y + att, p['se_w'][s - 1]))
        before.append(y)

    out = jnp.concatenate(ys, axis=-1)
    out = conv1x1(out, p['conv3_w'], p['conv3_b'], relu=False)
    # mod == 'ECA': x = mod(out); out = out + x
    out = out + eca_add(out, p['mod_w'])
    out = shrinkage_eca(out, p)
    if p['ds_w'] is not None:
        identity = conv1x1(identity, p['ds_w'], p['ds_b'], relu=False, stride=stride)
    return jnp.maximum(out + identity, 0.0)


def gated_fcn_forward(x, params, cfgs):
    """x: (B, L, inplanes) -> (B, maxlength). Mirrors GatedFCN.forward.
    (PyTorch permutes to NCW; we keep channels-last, which is equivalent.)"""
    x = conv1x1(x, params['pre_w'])                       # self.pre (no BN, no bias)
    for bp, cfg in zip(params['blocks'], cfgs):           # dropouts = identity (eval)
        x = block_forward(x, bp, cfg)
    pooled = jnp.mean(x, axis=1)                          # self.roi -> (B, 3072)
    out = pallas_matmul(pooled, params['map_w'])          # self.mapping -> (B, 18)
    return out                                            # .squeeze()


# ----------------------------------------------------------------------------
# Deterministic parameter init (BN folded, weights pre-transposed (K,N) in bf16)
# ----------------------------------------------------------------------------
def _bn_fold(key, c):
    k1, k2 = jax.random.split(key)
    gamma = 1.0 + 0.1 * jax.random.normal(k1, (c,), jnp.float32)
    beta = 0.1 * jax.random.normal(k2, (c,), jnp.float32)
    mean = jnp.zeros((c,), jnp.float32)
    var = jnp.ones((c,), jnp.float32)
    scale = gamma / jnp.sqrt(var + EPS)
    return scale, beta - mean * scale


def _init_conv1_bn(key, cin, cout):
    kw, kb = jax.random.split(key)
    w = jax.random.normal(kw, (cout, cin), jnp.float32) / math.sqrt(cin)
    s, b = _bn_fold(kb, cout)
    return jnp.transpose(w * s[:, None]).astype(jnp.bfloat16), b       # (cin, cout)


def _init_conv3_bn(key, cin, cout):
    kw, kb = jax.random.split(key)
    w = jax.random.normal(kw, (cout, cin, 3), jnp.float32) / math.sqrt(cin * 3)
    s, b = _bn_fold(kb, cout)
    return w * s[:, None, None], b                                      # (cout,cin,3)


def init_block(key, inplanes, planes_, stride, scales, has_downsample):
    exp = 4
    bott = planes_                        # groups = 1
    cs = bott // scales
    csP = _round_up(cs, 128)
    C = exp * planes_
    keys = iter(jax.random.split(key, 64))
    p = {}
    p['conv1_w'], p['conv1_b'] = _init_conv1_bn(next(keys), inplanes, bott)

    ws, bs = [], []
    for _ in range(scales - 1):
        w, b = _init_conv3_bn(next(keys), cs, cs)            # folded (cout, cin, 3)
        wk = jnp.transpose(w, (2, 1, 0))                     # (tap, cin, cout)
        wk = jnp.pad(wk, ((0, 0), (0, csP - cs), (0, csP - cs)))
        ws.append(wk.reshape(3 * csP, csP))                  # row = k*csP + ci
        bs.append(jnp.pad(b, (0, csP - cs)).reshape(1, csP))
    p['conv2_w'] = jnp.stack(ws).astype(jnp.bfloat16)        # (S-1, 3*csP, csP)
    p['conv2_b'] = jnp.stack(bs).astype(jnp.float32)         # (S-1, 1, csP)

    ks = eca_ksize(cs)
    p['se_w'] = [jax.random.normal(next(keys), (ks,), jnp.float32) / math.sqrt(ks)
                 for _ in range(scales - 1)]
    p['conv3_w'], p['conv3_b'] = _init_conv1_bn(next(keys), bott, C)
    km = eca_ksize(C)
    p['mod_w'] = jax.random.normal(next(keys), (km,), jnp.float32) / math.sqrt(km)
    p['shr_eca_w'] = jax.random.normal(next(keys), (3,), jnp.float32) / math.sqrt(3)
    p['shr_fc1_w'] = (jax.random.normal(next(keys), (C, C), jnp.float32)
                      / math.sqrt(C)).astype(jnp.bfloat16)   # stored as (in, out)
    p['shr_fc1_b'] = jnp.zeros((C,), jnp.float32)
    p['shr_fc2_w'] = (jax.random.normal(next(keys), (C, C), jnp.float32)
                      / math.sqrt(C)).astype(jnp.bfloat16)
    p['shr_fc2_b'] = jnp.zeros((C,), jnp.float32)
    if has_downsample:
        p['ds_w'], p['ds_b'] = _init_conv1_bn(next(keys), inplanes, C)
    else:
        p['ds_w'], p['ds_b'] = None, None
    cfg = {'stride': stride, 'scales': scales, 'cs': cs, 'csP': csP}
    return p, cfg


def init_gated_fcn(key, layers, maxlength=18, width=16, scales=6, inplanes=128):
    planes = [int(width * scales * 2 ** i) for i in range(4)]
    keys = iter(jax.random.split(key, 64))
    params = {}
    params['pre_w'] = (jax.random.normal(next(keys), (planes[0], inplanes), jnp.float32)
                       / math.sqrt(inplanes)).T.astype(jnp.bfloat16)
    inp = planes[0]
    blocks, cfgs = [], []
    for pli, nblocks, stride in zip(planes, layers, [1, 2, 2, 2]):
        has_ds = (stride != 1) or (inp != pli * 4)
        bp, cfg = init_block(next(keys), inp, pli, stride, scales, has_ds)
        blocks.append(bp); cfgs.append(cfg)
        inp = pli * 4
        for _ in range(1, nblocks):
            bp, cfg = init_block(next(keys), inp, pli, 1, scales, False)
            blocks.append(bp); cfgs.append(cfg)
    params['blocks'] = blocks
    # mapping = conv1(3072, maxlength); 4*planes[3] == 3072 with width=16, scales=6
    params['map_w'] = (jax.random.normal(next(keys), (maxlength, 4 * planes[3]), jnp.float32)
                       / math.sqrt(4 * planes[3])).T.astype(jnp.bfloat16)
    return params, cfgs


# ----------------------------------------------------------------------------
if __name__ == "__main__":
    key = jax.random.PRNGKey(0)
    kp, kx, ka, kb = jax.random.split(key, 4)

    # sanity check of the Pallas matmul kernel against a bf16-rounded jnp reference
    a = jax.random.normal(ka, (7, 50), jnp.float32)
    b = jax.random.normal(kb, (50, 19), jnp.float32)
    ref = (a.astype(jnp.bfloat16).astype(jnp.float32)
           @ b.astype(jnp.bfloat16).astype(jnp.float32))
    got = pallas_matmul(a, b)
    assert jnp.allclose(got, ref, atol=2e-2, rtol=2e-2), float(jnp.max(jnp.abs(got - ref)))

    LAYERS = [1, 1, 1, 1]                  # one GatedRes2NetBottleneck per stage
    B, L, CIN = 2, 16, 128                 # input is (batch, seq, 128) per forward()
    params, cfgs = init_gated_fcn(kp, LAYERS, maxlength=18, width=16, scales=6,
                                  inplanes=CIN)

    x = jax.random.normal(kx, (B, L, CIN), jnp.float32)
    fwd = jax.jit(lambda xx, pp: gated_fcn_forward(xx, pp, cfgs))
    out = jax.block_until_ready(fwd(x, params))

    assert out.shape == (B, 18), out.shape
    assert bool(jnp.all(jnp.isfinite(out)))
    print("KERNEL_OK")
</pallas_src>

<mosaic_0001>
module attributes {stable_mosaic.version = 11 : i64} {
  func.func @_matmul_kernel(%arg0: i32, %arg1: memref<16x128xbf16, #tpu.memory_space<vmem>>, %arg2: memref<128x256xbf16, #tpu.memory_space<vmem>>, %arg3: memref<1x256xf32, #tpu.memory_space<vmem>>, %arg4: memref<16x256xf32, #tpu.memory_space<vmem>>) attributes {dimension_semantics = [#tpu.dimension_semantics<parallel>], iteration_bounds = array<i64: 1>, scalar_prefetch = 0 : i64, scratch_operands = 0 : i64, tpu.core_type = #tpu.core_type<tc>, window_params = [{pipeline_mode = #tpu.pipeline_mode<synchronous>, transform_indices = @transform_0, window_bounds = array<i64: 16, 128>}, {transform_indices = @transform_1, window_bounds = array<i64: 128, 256>}, {transform_indices = @transform_2, window_bounds = array<i64: 1, 256>}, {transform_indices = @transform_3, window_bounds = array<i64: 16, 256>}]} {
    %c0 = arith.constant 0 : index
    %c0_0 = arith.constant 0 : index
    %0 = vector.load %arg1[%c0, %c0_0] : memref<16x128xbf16, #tpu.memory_space<vmem>>, vector<16x128xbf16>
    %c0_1 = arith.constant 0 : index
    %c0_2 = arith.constant 0 : index
    %1 = vector.load %arg2[%c0_1, %c0_2] : memref<128x256xbf16, #tpu.memory_space<vmem>>, vector<128x256xbf16>
    %cst = arith.constant dense<0.000000e+00> : vector<16x256xf32>
    %2 = tpu.matmul %0, %1, %cst {dimension_numbers = #tpu.dot_dimension_numbers<[1], [0], [0], [1], [0, 0, 1, 1], [], []>} : vector<16x128xbf16>, vector<128x256xbf16>, vector<16x256xf32> -> vector<16x256xf32>
    %c0_3 = arith.constant 0 : index
    %c0_4 = arith.constant 0 : index
    %3 = vector.load %arg3[%c0_3, %c0_4] : memref<1x256xf32, #tpu.memory_space<vmem>>, vector<1x256xf32>
    %4 = vector.broadcast %3 : vector<1x256xf32> to vector<16x256xf32>
    %5 = arith.addf %2, %4 : vector<16x256xf32>
    %c0_5 = arith.constant 0 : index
    %c0_6 = arith.constant 0 : index
    %6 = vector.load %arg4[%c0_5, %c0_6] : memref<16x256xf32, #tpu.memory_space<vmem>>, vector<16x256xf32>
    tpu.vector_store %arg4[%c0_5, %c0_6], %5 {strides = array<i32>} : memref<16x256xf32, #tpu.memory_space<vmem>>, vector<16x256xf32>,
    return
  }
  func.func @transform_0(%arg0: i32) -> (i32, i32) {
    %c0_i32 = arith.constant 0 : i32
    %c0_i32_0 = arith.constant 0 : i32
    %c0_i32_1 = arith.constant 0 : i32
    return %c0_i32, %c0_i32_0 : i32, i32
  }
  func.func @transform_1(%arg0: i32) -> (i32, i32) {
    %c0_i32 = arith.constant 0 : i32
    %c0_i32_0 = arith.constant 0 : i32
    return %c0_i32, %arg0 : i32, i32
  }
  func.func @transform_2(%arg0: i32) -> (i32, i32) {
    %c0_i32 = arith.constant 0 : i32
    %c0_i32_0 = arith.constant 0 : i32
    return %c0_i32, %arg0 : i32, i32
  }
  func.func @transform_3(%arg0: i32) -> (i32, i32) {
    %c0_i32 = arith.constant 0 : i32
    %c0_i32_0 = arith.constant 0 : i32
    return %c0_i32, %arg0 : i32, i32
  }
}

</mosaic_0001>

<bundles_post_ra>
// kernel: tpu_custom_call.1
= control target key start
LH: loop header
LB: loop body
LE: loop exit
PB: predicated region body
PF: predicated region fallthrough
CT: control target
= control target key end

     0   :  { %8 = vsyncpa [#allocation3], 0  ;;  %s418_s0 = inlined_call_operand.hbm [shape: bf16[16,128], index: 0, kind: input, shape index: {}]   ;;  %s419_s1 = inlined_call_operand.hbm [shape: bf16[128,256], index: 1, kind: input, shape index: {}]   ;;  %s420_s2 = inlined_call_operand.vmem [shape: f32[1,256], index: 2, kind: input, shape index: {}]   ;;  %s421_s3 = inlined_call_operand.hbm [shape: f32[16,256], index: 3, kind: output, shape index: {}]  }
   0x1   :  { %9 = vsyncpa [#allocation6], 0 }
   0x2   :  { %10 = vsyncpa [#allocation4], 0  ;;  %s349_s12 = smov [#allocation2]   ;;  %s277_s16 = scalar_lea.hbm %s418_s0, 128 }
   0x3   :  { %s16_s13 = sshll.u32 %s349_s12, 4  ;;  %p278_p0 = scmp.ne.s32.totalorder %s418_s0, %s277_s16  ;;  %s17_s13 = int_to_ptr.vmem [resolvable:$true] %s16_s13 }
   0x4   :  { %p281_p1 = scmp.lt.u32.totalorder %s277_s16, %s418_s0 }
   0x6   :  { %p283_p2 = pnand %p281_p1, %p278_p0 }
   0x8   :  { %286 = shalt.err (!%p283_p2)
}
   0x9   :  { %s287_s21 = scalar_lea.vmem %s17_s13, 128  ;;  %p292_p4 = scmp.lt.s32.totalorder %s17_s13, %s17_s13 }
   0xa   :  { %p288_p3 = scmp.ne.s32.totalorder %s17_s13, %s287_s21  ;;  %p293_p5 = scmp.lt.s32.totalorder %s287_s21, %s287_s21 }
   0xc   :  { %p294_p6 = por %p293_p5, %p292_p4 }
   0xe   :  { %p295_p7 = pnand %p294_p6, %p288_p3 }
  0x10   :  { %298 = shalt.err (!%p295_p7)
}
  0x11   :  { %s350_s22 = smov 64   ;;  %s351_s23 = smov 4  }
  0x12   :  { %22 = dma.hbm_to_vmem [thread:$0]  %s418_s0, 128, %s17_s13, [#allocation3], %s350_s22, %s350_s22, %s351_s23  }
  0x13   :  { %s352_s26 = smov [#allocation5]   ;;  %s299_s30 = scalar_lea.hbm %s419_s1, 2048 }
  0x14   :  { %s28_s27 = sshll.u32 %s352_s26, 4  ;;  %p300_p8 = scmp.ne.s32.totalorder %s419_s1, %s299_s30  ;;  %s29_s27 = int_to_ptr.vmem [resolvable:$true] %s28_s27 }
  0x15   :  { %p303_p9 = scmp.lt.u32.totalorder %s299_s30, %s419_s1 }
  0x17   :  { %p305_p10 = pnand %p303_p9, %p300_p8 }
  0x19   :  { %308 = shalt.err (!%p305_p10)
}
  0x1a   :  { %s309_s8 = scalar_lea.vmem %s29_s27, 2048  ;;  %p314_p12 = scmp.lt.s32.totalorder %s29_s27, %s29_s27 }
  0x1b   :  { %p310_p11 = scmp.ne.s32.totalorder %s29_s27, %s309_s8  ;;  %p315_p13 = scmp.lt.s32.totalorder %s309_s8, %s309_s8 }
  0x1d   :  { %p316_p0 = por %p315_p13, %p314_p12 }
  0x1f   :  { %p317_p1 = pnand %p316_p0, %p310_p11 }
  0x21   :  { %320 = shalt.err (!%p317_p1)
}
  0x22   :  { %s353_s0 = smov 128   ;;  %s354_s9 = smov 8  }
  0x23   :  { %34 = dma.hbm_to_vmem [thread:$0]  %s419_s1, 2048, %s29_s27, [#allocation6], %s353_s0, %s353_s0, %s354_s9  }
  0x24   :  { %343 = dma.done.wait [#allocation3], 128  }
  0x25   :  { %344 = vsyncadd [#allocation3], 4294967168 }
  0x26   :  { %345 = dma.done.wait [#allocation6], 2048  }
  0x27   :  { %346 = vsyncadd [#allocation6], 4294965248  ;;  %v355_v0 = vmov 0   ;;  %v252_v1 = vld [vmem:[#allocation5 + $0x4] ss:$8 sps:$4 sm:$0xff]   ;;  %v276_v17 = vld [vmem:[#allocation2] sm:$0xff]   ;;  %v64_v18 = vlaneseq }
  0x28   :  { %192 = vmatprep.mubr.bf16.mxu0 %v355_v0  ;;  %v254_v2 = vld [vmem:[#allocation5] ss:$8 sps:$4 sm:$0xff]   ;;  %160 = vmatprep.subr.bf16.mxu0 %v252_v1  ;;  %v255_v3 = vld [vmem:[#allocation5 + $0x14] ss:$8 sps:$4 sm:$0xff]   ;;  %v257_v4 = vld [vmem:[#allocation5 + $0x10] ss:$8 sps:$4 sm:$0xff]  }
  0x29   :  { %161 = vmatpush1.bf16.msra.mxu0 %v254_v2  ;;  %v258_v5 = vld [vmem:[#allocation5 + $0x24] ss:$8 sps:$4 sm:$0xff]   ;;  %v260_v6 = vld [vmem:[#allocation5 + $0x20] ss:$8 sps:$4 sm:$0xff]   ;;  %v261_v7 = vld [vmem:[#allocation5 + $0x34] ss:$8 sps:$4 sm:$0xff]  }
  0x2a   :  { %162 = vmatprep.subr.bf16.mxu0 %v255_v3  ;;  %v263_v8 = vld [vmem:[#allocation5 + $0x30] ss:$8 sps:$4 sm:$0xff]   ;;  %v264_v9 = vld [vmem:[#allocation5 + $0x44] ss:$8 sps:$4 sm:$0xff]   ;;  %v266_v10 = vld [vmem:[#allocation5 + $0x40] ss:$8 sps:$4 sm:$0xff]  }
  0x2b   :  { %v267_v11 = vld [vmem:[#allocation5 + $0x54] ss:$8 sps:$4 sm:$0xff]   ;;  %v269_v12 = vld [vmem:[#allocation5 + $0x50] ss:$8 sps:$4 sm:$0xff]   ;;  %v270_v13 = vld [vmem:[#allocation5 + $0x64] ss:$8 sps:$4 sm:$0xff]  }
  0x2c   :  { %v272_v14 = vld [vmem:[#allocation5 + $0x60] ss:$8 sps:$4 sm:$0xff]   ;;  %v273_v15 = vld [vmem:[#allocation5 + $0x74] ss:$8 sps:$4 sm:$0xff]   ;;  %v275_v16 = vld [vmem:[#allocation5 + $0x70] ss:$8 sps:$4 sm:$0xff]  }
  0x2d   :  { %163 = vmatpush1.bf16.msra.mxu0 %v257_v4  ;;  %v65_v19 = vshrl.u32 %v64_v18, 7  ;;  %v62_v21 = vld [vmem:[%s420_s2] sm:$0x3]  ;;  %s356_s13 = smov [#allocation7]  }
  0x2e   :  { %164 = vmatprep.subr.bf16.mxu0 %v258_v5  ;;  %s212_s14 = sshll.u32 %s356_s13, 4  ;;  %s213_s14 = int_to_ptr.vmem [resolvable:$true] %s212_s14 }
  0x2f   :  { %v66_v20 = vsub.s32 0, %v65_v19  ;;  %v70_v22 = vsub.s32 1, %v65_v19  ;;  %s321_s15 = scalar_lea.vmem %s213_s14, 512  ;;  %p326_p3 = scmp.lt.s32.totalorder %s213_s14, %s213_s14 }
  0x30   :  { %p322_p2 = scmp.ne.s32.totalorder %s213_s14, %s321_s15  ;;  %p327_p4 = scmp.lt.s32.totalorder %s321_s15, %s321_s15 }
  0x31   :  { %165 = vmatpush1.bf16.msra.mxu0 %v260_v6  ;;  %v67_v23 = vrot.slane %v62_v21, %v66_v20  ;;  %v71_v24 = vrot.slane %v62_v21, %v70_v22 }
  0x32   :  { %166 = vmatprep.subr.bf16.mxu0 %v261_v7  ;;  %p328_p5 = por %p327_p4, %p326_p3 }
  0x34   :  { %p329_p6 = pnand %p328_p5, %p322_p2 }
  0x35   :  { %167 = vmatpush1.bf16.msra.mxu0 %v263_v8 }
  0x36   :  { %168 = vmatprep.subr.bf16.mxu0 %v264_v9 }
  0x39   :  { %169 = vmatpush1.bf16.msra.mxu0 %v266_v10 }
  0x3a   :  { %170 = vmatprep.subr.bf16.mxu0 %v267_v11 }
  0x3d   :  { %171 = vmatpush1.bf16.msra.mxu0 %v269_v12 }
  0x3e   :  { %172 = vmatprep.subr.bf16.mxu0 %v270_v13 }
  0x41   :  { %173 = vmatpush1.bf16.msra.mxu0 %v272_v14 }
  0x42   :  { %174 = vmatprep.subr.bf16.mxu0 %v273_v15 }
  0x45   :  { %175 = vmatpush1.bf16.msra.mxu0 %v275_v16 }
  0x48   :  { %193 = vmatmul.mubr.bf16.vlgmr.msra.gmra.mrb[0].mxu0 %v276_v17 }
 0x11b   :  { %v194_v25 = vpop.f32.mrb[0].mxu0 }
 0x11c   :  { %v195_v26 = vadd.f32 %v194_v25, %v67_v23  ;;  %v196_v27 = vpop.f32.mrb[1].mxu0 }
 0x11d   :  { %v197_v28 = vadd.f32 %v196_v27, %v71_v24  ;;  %v198_v29 = vpop.f32.mrb[2].mxu0 }
 0x11e   :  { %203 = vst [vmem:[#allocation7] sm:$0xff] %v195_v26  ;;  %v199_v30 = vadd.f32 %v198_v29, %v67_v23  ;;  %v200_v31 = vpop.f32.mrb[3].mxu0 }
 0x11f   :  { %204 = vst [vmem:[#allocation7 + $0x8] sm:$0xff] %v197_v28  ;;  %v201_v32 = vadd.f32 %v200_v31, %v71_v24 }
 0x120   :  { %205 = vst [vmem:[#allocation7 + $0x10] sm:$0xff] %v199_v30 }
 0x121   :  { %206 = vst [vmem:[#allocation7 + $0x18] sm:$0xff] %v201_v32 }
 0x122   :  { %332 = shalt.err (!%p329_p6)
}
 0x123   :  { %s333_s17 = scalar_lea.hbm %s421_s3, 512 }
 0x124   :  { %p334_p7 = scmp.ne.s32.totalorder %s421_s3, %s333_s17  ;;  %p337_p8 = scmp.lt.u32.totalorder %s333_s17, %s421_s3 }
 0x126   :  { %p339_p9 = pnand %p337_p8, %p334_p7 }
 0x128   :  { %342 = shalt.err (!%p339_p9)
}
 0x129   :  { %s357_s22 = smov 256   ;;  %s358_s23 = smov 16  }
 0x12a   :  { %218 = dma.vmem_to_hbm [thread:$0]  %s213_s14, 512, %s421_s3, [#allocation4], %s357_s22, %s357_s22, %s358_s23  }
 0x12b   :  { %347 = dma.done.wait [#allocation4], 512  }
 0x12c   :  { %348 = vsyncadd [#allocation4], 4294966784 }
 0x12d   :  { %222 = vsyncpa [#allocation3], 1 }
 0x12e   :  { %223 = vsyncpa [#allocation6], 1 }
 0x12f   :  { %224 = vsyncpa [#allocation4], 1 }

</bundles_post_ra>
